<compile_context>
chip_gen: v7x
topology: tpu7x:2x2x1
jax: 0.10.0
libtpu: 0.0.40
codegen_flags: <defaults>
</compile_context>

<pallas_src>
import functools
import numpy as np

import jax
import jax.numpy as jnp
from jax.experimental import pallas as pl
from jax.experimental.pallas import tpu as pltpu

# ----------------------------- configuration -----------------------------
SAMPLE_RATE = 16000
N_MELS = 16
N_FFT = 128
HOP_LENGTH = 32
WIN_LENGTH = N_FFT          # default: win_length = n_fft
F_MIN = 0.0
F_MAX = SAMPLE_RATE // 2

N_FREQ = N_FFT // 2 + 1                 # one-sided STFT bins (65)
N_FREQ2 = N_FFT + 1                     # one-sided bins of the 2*n_fft rfft (129)
MIN_PERIOD = SAMPLE_RATE // 1000        # 16
MAX_PERIOD = SAMPLE_RATE // 80          # 200
N_LAGS = MAX_PERIOD - MIN_PERIOD + 1    # 185

HOPS_PER_FRAME = N_FFT // HOP_LENGTH    # 4
OUT_WIDTH = 128                         # lane-dense output slab (>= n_mels + 2)
MAX_TILE_T = 1024                       # frames per grid step


# ----------------------------- Pallas kernel ------------------------------
def _feature_kernel(hops_a_ref, hops_b_ref, dft_ref, fb2_ref, ic2_ref, ethr_ref,
                    out_ref, *, sample_rate, min_period):
    tile_t = hops_a_ref.shape[0]
    size0 = tile_t + hops_b_ref.shape[0]                   # tile_t + 8

    # ---- in-kernel frame assembly: frame t = 4 consecutive hop rows --------
    h = jnp.concatenate([hops_a_ref[...], hops_b_ref[...]], axis=0)   # (T+8, 32)
    p0 = h[:tile_t, :]                                                 # h[t + 0]
    p1 = pltpu.roll(h, shift=size0 - 1, axis=0)[:tile_t, :]           # h[t + 1]
    p2 = pltpu.roll(h, shift=size0 - 2, axis=0)[:tile_t, :]           # h[t + 2]
    p3 = pltpu.roll(h, shift=size0 - 3, axis=0)[:tile_t, :]           # h[t + 3]
    frames = jnp.concatenate([p0, p1, p2, p3], axis=-1)               # (T, 128)
    n_fft = frames.shape[-1]

    # ---- mel DFT (Hann folded) + pitch DFT (centering folded): ONE matmul --
    rr = jnp.dot(frames, dft_ref[...],
                 preferred_element_type=jnp.float32)                   # (T, 384)
    ri = rr[:, :n_fft]            # (T, 128) windowed cos|sin (zero cols trimmed)
    rip = rr[:, n_fft:]           # (T, 256) centered cos|sin (zero cols trimmed)

    # (re^2 + im^2) @ fb  ==  (ri*ri) @ row-stacked fb   (exact)
    mel = jnp.dot(ri * ri, fb2_ref[...], preferred_element_type=jnp.float32)
    mel = jnp.log(jnp.maximum(mel, 1e-10))

    # ---- energy (uncentered frames) + centered-frame norm (pitch gate) -----
    energy = jnp.sqrt(jnp.sum(frames * frames, axis=-1, keepdims=True))  # (T,1)
    e_thr = ethr_ref[0, 0]                                  # global threshold
    mean = jnp.sum(frames, axis=-1, keepdims=True) * (1.0 / n_fft)
    xc = frames - mean
    nrm2 = jnp.sum(xc * xc, axis=-1, keepdims=True)         # explicit (no cancellation)

    # ---- pitch via autocorrelation (irfft-as-matmul) ----
    ac = jnp.dot(rip * rip, ic2_ref[...],
                 preferred_element_type=jnp.float32)        # (T, n_lags)
    inv = pl.reciprocal(nrm2 + 1e-10)                       # hoisted 1/x per row
    acn = ac * inv

    max_vals = jnp.max(acn, axis=-1, keepdims=True)         # (T, 1)
    lag_iota = jax.lax.broadcasted_iota(jnp.int32, acn.shape, 1)
    big = jnp.int32(acn.shape[1])
    max_idxs = jnp.min(jnp.where(acn >= max_vals, lag_iota, big),
                       axis=-1, keepdims=True)              # first arg-max

    pitch = sample_rate / (max_idxs.astype(jnp.float32) + min_period + 1e-10)
    pitch = jnp.where(max_vals < 0.3, 0.0, pitch)
    pitch = jnp.where(energy < e_thr, 0.0, pitch)           # raw (un-smoothed)

    # ---- single lane-dense store: [mel | pitch | energy | 0pad] ----
    pad_cols = out_ref.shape[-1] - (mel.shape[-1] + 2)
    out_ref[...] = jnp.concatenate(
        [mel, pitch, energy,
         jnp.zeros((tile_t, pad_cols), jnp.float32)], axis=-1)


# ------------------------ deterministic parameters ------------------------
def _mel_fbanks_htk(n_freqs, f_min, f_max, n_mels, sample_rate):
    # torchaudio.functional.melscale_fbanks(norm=None, mel_scale="htk")
    all_freqs = np.linspace(0.0, sample_rate // 2, n_freqs)

    def hz_to_mel(f):
        return 2595.0 * np.log10(1.0 + f / 700.0)

    def mel_to_hz(m):
        return 700.0 * (10.0 ** (m / 2595.0) - 1.0)

    m_pts = np.linspace(hz_to_mel(f_min), hz_to_mel(f_max), n_mels + 2)
    f_pts = mel_to_hz(m_pts)
    f_diff = f_pts[1:] - f_pts[:-1]                          # (n_mels+1,)
    slopes = f_pts[None, :] - all_freqs[:, None]             # (n_freqs, n_mels+2)
    down = -slopes[:, :-2] / f_diff[:-1]
    up = slopes[:, 2:] / f_diff[1:]
    return np.maximum(0.0, np.minimum(down, up))             # (n_freqs, n_mels) f64


def _irfft_cos_matrix(n_fft, min_period, max_period):
    # irfft(power_spectrum, n=2*n_fft)[..., min_period:max_period+1] as a matmul.
    m = 2 * n_fft
    f = np.arange(n_fft + 1)[:, None].astype(np.float64)
    k = np.arange(min_period, max_period + 1)[None, :].astype(np.float64)
    w = np.full((n_fft + 1, 1), 2.0)
    w[0, 0] = 1.0
    w[-1, 0] = 1.0
    return w * np.cos(2.0 * np.pi * k * f / m) / m            # (n_fft+1, n_lags) f64


@functools.lru_cache(maxsize=1)
def _constants():
    n = N_FFT
    t = np.arange(n, dtype=np.float64)[:, None]
    win = 0.5 - 0.5 * np.cos(2.0 * np.pi * np.arange(n, dtype=np.float64) / n)

    # mel path: length-n DFT, one-sided bins 0..n/2; imag bins 0 and Nyquist
    # are identically zero -> trimmed so the block is exactly (128, 128).
    f_m = np.arange(N_FREQ, dtype=np.float64)[None, :]
    ang_m = 2.0 * np.pi * t * f_m / n
    dft_mel = np.concatenate([np.cos(ang_m), -np.sin(ang_m)[:, 1:N_FREQ - 1]], axis=1)
    dft_mel = win[:, None] * dft_mel                          # fold Hann window

    fb = _mel_fbanks_htk(N_FREQ, F_MIN, F_MAX, N_MELS, SAMPLE_RATE)    # (65, 16)
    fb2 = np.concatenate([fb, fb[1:N_FREQ - 1]], axis=0)               # (128, 16)

    # pitch path: length-2n DFT of the n-sample frame, bins 0..n; same trim.
    f_p = np.arange(N_FREQ2, dtype=np.float64)[None, :]
    ang_p = 2.0 * np.pi * t * f_p / (2 * n)
    dft_pit = np.concatenate([np.cos(ang_p), -np.sin(ang_p)[:, 1:N_FREQ2 - 1]], axis=1)
    center = np.eye(n) - np.full((n, n), 1.0 / n)
    dft_pit = center @ dft_pit                                # fold mean-centering

    ic = _irfft_cos_matrix(n, MIN_PERIOD, MAX_PERIOD)         # (129, 185)
    ic2 = np.concatenate([ic, ic[1:N_FREQ2 - 1]], axis=0)     # (256, 185)

    dft_big = np.concatenate([dft_mel, dft_pit], axis=1)      # (128, 384)
    return (dft_big.astype(np.float32), fb2.astype(np.float32),
            ic2.astype(np.float32))


def _round_up(x, m):
    return ((x + m - 1) // m) * m


# ------------------------------- wrapper -----------------------------------
@jax.jit
def feature_extractor_forward(waveform):
    """waveform: f32[time] (mono, at SAMPLE_RATE). Returns f32[T, n_mels + 2]."""
    waveform = jnp.asarray(waveform, jnp.float32)
    seq_len = waveform.shape[0]
    pad = N_FFT // 2
    padded = jnp.pad(waveform, (pad, pad), mode="reflect")
    n_frames = seq_len // HOP_LENGTH + 1

    # tile/grid: large tiles to amortize per-step overhead, but >= 2 grid
    # steps whenever possible so the second v7x TensorCore gets work.
    tile_t = min(MAX_TILE_T, _round_up(max(-(-n_frames // 2), 8), 8))
    t_pad = _round_up(n_frames, tile_t)
    n_steps = t_pad // tile_t

    # hop-major layout: frames are assembled in-kernel from 4 consecutive
    # 32-sample hop rows (n_fft == 4*hop) -> kernel input HBM traffic is 1x
    # the waveform instead of a 4x-inflated pre-gathered frame matrix.
    n_hops = t_pad + 8
    padded = jnp.pad(padded, (0, n_hops * HOP_LENGTH - padded.shape[0]))
    hops = padded.reshape(n_hops, HOP_LENGTH)

    # global energy threshold (0.1 * max frame L2 norm) from O(seq) hop sums
    hsum = jnp.sum(hops * hops, axis=1)
    e2 = (hsum[0:n_frames] + hsum[1:n_frames + 1]
          + hsum[2:n_frames + 2] + hsum[3:n_frames + 3])
    e_thr = (0.1 * jnp.sqrt(jnp.max(e2))).reshape(1, 1).astype(jnp.float32)

    dft_big, fb2, ic2 = _constants()    # cached; baked in as jit constants

    kernel = functools.partial(
        _feature_kernel,
        sample_rate=float(SAMPLE_RATE),
        min_period=float(MIN_PERIOD),
    )

    tile_b = tile_t // 8
    const_spec = lambda shape: pl.BlockSpec(shape, lambda i: (0, 0))
    out = pl.pallas_call(
        kernel,
        out_shape=jax.ShapeDtypeStruct((t_pad, OUT_WIDTH), jnp.float32),
        grid=(n_steps,),
        in_specs=[
            pl.BlockSpec((tile_t, HOP_LENGTH), lambda i: (i, 0)),       # hop rows
            pl.BlockSpec((8, HOP_LENGTH),
                         lambda i: (i * tile_b + tile_b, 0)),           # +8 lookahead rows
            const_spec((N_FFT, 3 * N_FFT)),                             # fused DFT (128,384)
            const_spec((N_FFT, N_MELS)),                                # stacked mel fb
            const_spec((2 * N_FFT, N_LAGS)),                            # stacked irfft cos
            pl.BlockSpec(memory_space=pltpu.MemorySpace.SMEM),          # e_thr scalar
        ],
        out_specs=pl.BlockSpec((tile_t, OUT_WIDTH), lambda i: (i, 0)),
        compiler_params=pltpu.CompilerParams(
            dimension_semantics=("parallel",),
            vmem_limit_bytes=32 * 1024 * 1024,
        ),
    )(hops, hops, dft_big, fb2, ic2, e_thr)

    # slice the valid region out of the lane-dense slab
    mel = out[:n_frames, :N_MELS]
    pitch = out[:n_frames, N_MELS]
    energy = out[:n_frames, N_MELS + 1:N_MELS + 2]

    # 3-tap pitch smoothing (avg_pool1d k=3, s=1, p=1, count_include_pad=True)
    if n_frames > 1:
        p_pad = jnp.pad(pitch, (1, 1))
        pitch = (p_pad[:-2] + p_pad[1:-1] + p_pad[2:]) / 3.0
    pitch = pitch[:, None]

    return jnp.concatenate([mel, pitch, energy], axis=-1)


# --------------------------------- main -------------------------------------
if __name__ == "__main__":
    key = jax.random.PRNGKey(0)
    seq_len = 1024                                   # small synthetic waveform
    waveform = 0.1 * jax.random.normal(key, (seq_len,), dtype=jnp.float32)

    feats = feature_extractor_forward(waveform)
    feats = jax.block_until_ready(feats)

    expected_t = seq_len // HOP_LENGTH + 1
    assert feats.shape == (expected_t, N_MELS + 2), feats.shape
    assert bool(jnp.all(jnp.isfinite(feats)))
    print("KERNEL_OK")
</pallas_src>

<mosaic_0001>
module attributes {stable_mosaic.version = 11 : i64} {
  func.func @_feature_kernel(%arg0: i32, %arg1: memref<24x32xf32, #tpu.memory_space<vmem>>, %arg2: memref<8x32xf32, #tpu.memory_space<vmem>>, %arg3: memref<128x384xf32, #tpu.memory_space<vmem>>, %arg4: memref<128x16xf32, #tpu.memory_space<vmem>>, %arg5: memref<256x185xf32, #tpu.memory_space<vmem>>, %arg6: memref<1x1xf32, #tpu.memory_space<smem>>, %arg7: memref<24x128xf32, #tpu.memory_space<vmem>>) attributes {dimension_semantics = [#tpu.dimension_semantics<parallel>], iteration_bounds = array<i64: 2>, scalar_prefetch = 0 : i64, scratch_operands = 0 : i64, tpu.core_type = #tpu.core_type<tc>, window_params = [{transform_indices = @transform_0, window_bounds = array<i64: 24, 32>}, {transform_indices = @transform_1, window_bounds = array<i64: 8, 32>}, {pipeline_mode = #tpu.pipeline_mode<synchronous>, transform_indices = @transform_2, window_bounds = array<i64: 128, 384>}, {pipeline_mode = #tpu.pipeline_mode<synchronous>, transform_indices = @transform_3, window_bounds = array<i64: 128, 16>}, {pipeline_mode = #tpu.pipeline_mode<synchronous>, transform_indices = @transform_4, window_bounds = array<i64: 256, 185>}, {transform_indices = @transform_5, window_bounds = array<i64: 1, 1>}, {transform_indices = @transform_6, window_bounds = array<i64: 24, 128>}]} {
    %c0 = arith.constant 0 : index
    %c0_0 = arith.constant 0 : index
    %0 = vector.load %arg1[%c0, %c0_0] : memref<24x32xf32, #tpu.memory_space<vmem>>, vector<24x32xf32>
    %c0_1 = arith.constant 0 : index
    %c0_2 = arith.constant 0 : index
    %1 = vector.load %arg2[%c0_1, %c0_2] : memref<8x32xf32, #tpu.memory_space<vmem>>, vector<8x32xf32>
    %2 = tpu.concatenate %0, %1 in 0 : vector<24x32xf32>, vector<8x32xf32> -> vector<32x32xf32>
    %3 = vector.extract_strided_slice %2 {offsets = [0, 0], sizes = [24, 32], strides = [1, 1]} : vector<32x32xf32> to vector<24x32xf32>
    %c31_i32 = arith.constant 31 : i32
    %4 = tpu.dynamic_rotate %2 by %c31_i32 dim 0 : vector<32x32xf32>, i32 -> vector<32x32xf32>
    %5 = vector.extract_strided_slice %4 {offsets = [0, 0], sizes = [24, 32], strides = [1, 1]} : vector<32x32xf32> to vector<24x32xf32>
    %c30_i32 = arith.constant 30 : i32
    %6 = tpu.dynamic_rotate %2 by %c30_i32 dim 0 : vector<32x32xf32>, i32 -> vector<32x32xf32>
    %7 = vector.extract_strided_slice %6 {offsets = [0, 0], sizes = [24, 32], strides = [1, 1]} : vector<32x32xf32> to vector<24x32xf32>
    %c29_i32 = arith.constant 29 : i32
    %8 = tpu.dynamic_rotate %2 by %c29_i32 dim 0 : vector<32x32xf32>, i32 -> vector<32x32xf32>
    %9 = vector.extract_strided_slice %8 {offsets = [0, 0], sizes = [24, 32], strides = [1, 1]} : vector<32x32xf32> to vector<24x32xf32>
    %10 = tpu.concatenate %3, %5, %7, %9 in 1 : vector<24x32xf32>, vector<24x32xf32>, vector<24x32xf32>, vector<24x32xf32> -> vector<24x128xf32>
    %c0_3 = arith.constant 0 : index
    %c0_4 = arith.constant 0 : index
    %11 = vector.load %arg3[%c0_3, %c0_4] : memref<128x384xf32, #tpu.memory_space<vmem>>, vector<128x384xf32>
    %cst = arith.constant dense<0.000000e+00> : vector<24x384xf32>
    %12 = tpu.matmul %10, %11, %cst {dimension_numbers = #tpu.dot_dimension_numbers<[1], [0], [0], [1], [0, 0, 1, 1], [], []>} : vector<24x128xf32>, vector<128x384xf32>, vector<24x384xf32> -> vector<24x384xf32>
    %13 = vector.extract_strided_slice %12 {offsets = [0, 0], sizes = [24, 128], strides = [1, 1]} : vector<24x384xf32> to vector<24x128xf32>
    %14 = vector.extract_strided_slice %12 {offsets = [0, 128], sizes = [24, 256], strides = [1, 1]} : vector<24x384xf32> to vector<24x256xf32>
    %15 = arith.mulf %13, %13 : vector<24x128xf32>
    %c0_5 = arith.constant 0 : index
    %c0_6 = arith.constant 0 : index
    %16 = vector.load %arg4[%c0_5, %c0_6] : memref<128x16xf32, #tpu.memory_space<vmem>>, vector<128x16xf32>
    %cst_7 = arith.constant dense<0.000000e+00> : vector<24x16xf32>
    %17 = tpu.matmul %15, %16, %cst_7 {dimension_numbers = #tpu.dot_dimension_numbers<[1], [0], [0], [1], [0, 0, 1, 1], [], []>} : vector<24x128xf32>, vector<128x16xf32>, vector<24x16xf32> -> vector<24x16xf32>
    %cst_8 = arith.constant 1.000000e-10 : f32
    %18 = vector.broadcast %cst_8 : f32 to vector<24x16xf32>
    %19 = arith.maximumf %17, %18 : vector<24x16xf32>
    %20 = math.log %19 : vector<24x16xf32>
    %21 = arith.mulf %10, %10 : vector<24x128xf32>
    %cst_9 = arith.constant dense<0.000000e+00> : vector<24xf32>
    %22 = vector.multi_reduction <add>, %21, %cst_9 [1] : vector<24x128xf32> to vector<24xf32>
    %23 = vector.shape_cast %22 : vector<24xf32> to vector<24x1xf32>
    %24 = math.sqrt %23 : vector<24x1xf32>
    %c0_10 = arith.constant 0 : index
    %c0_11 = arith.constant 0 : index
    %25 = memref.load %arg6[%c0_10, %c0_11] : memref<1x1xf32, #tpu.memory_space<smem>>
    %cst_12 = arith.constant dense<0.000000e+00> : vector<24xf32>
    %26 = vector.multi_reduction <add>, %10, %cst_12 [1] : vector<24x128xf32> to vector<24xf32>
    %27 = vector.shape_cast %26 : vector<24xf32> to vector<24x1xf32>
    %cst_13 = arith.constant 7.812500e-03 : f32
    %28 = vector.broadcast %cst_13 : f32 to vector<24x1xf32>
    %29 = arith.mulf %27, %28 : vector<24x1xf32>
    %30 = vector.broadcast %29 : vector<24x1xf32> to vector<24x128xf32>
    %31 = arith.subf %10, %30 : vector<24x128xf32>
    %32 = arith.mulf %31, %31 : vector<24x128xf32>
    %cst_14 = arith.constant dense<0.000000e+00> : vector<24xf32>
    %33 = vector.multi_reduction <add>, %32, %cst_14 [1] : vector<24x128xf32> to vector<24xf32>
    %34 = vector.shape_cast %33 : vector<24xf32> to vector<24x1xf32>
    %35 = arith.mulf %14, %14 : vector<24x256xf32>
    %c0_15 = arith.constant 0 : index
    %c0_16 = arith.constant 0 : index
    %36 = vector.load %arg5[%c0_15, %c0_16] : memref<256x185xf32, #tpu.memory_space<vmem>>, vector<256x185xf32>
    %cst_17 = arith.constant dense<0.000000e+00> : vector<24x185xf32>
    %37 = tpu.matmul %35, %36, %cst_17 {dimension_numbers = #tpu.dot_dimension_numbers<[1], [0], [0], [1], [0, 0, 1, 1], [], []>} : vector<24x256xf32>, vector<256x185xf32>, vector<24x185xf32> -> vector<24x185xf32>
    %cst_18 = arith.constant 1.000000e-10 : f32
    %38 = vector.broadcast %cst_18 : f32 to vector<24x1xf32>
    %39 = arith.addf %34, %38 : vector<24x1xf32>
    %40 = tpu.reciprocal %39 : vector<24x1xf32> -> vector<24x1xf32>
    %41 = vector.broadcast %40 : vector<24x1xf32> to vector<24x185xf32>
    %42 = arith.mulf %37, %41 : vector<24x185xf32>
    %cst_19 = arith.constant dense<0xFF800000> : vector<24xf32>
    %43 = vector.multi_reduction <maximumf>, %42, %cst_19 [1] : vector<24x185xf32> to vector<24xf32>
    %44 = vector.shape_cast %43 : vector<24xf32> to vector<24x1xf32>
    %45 = tpu.iota {dimensions = array<i32: 1>} : vector<24x185xi32>
    %46 = vector.broadcast %44 : vector<24x1xf32> to vector<24x185xf32>
    %47 = arith.cmpf oge, %42, %46 : vector<24x185xf32>
    %c185_i32 = arith.constant 185 : i32
    %48 = vector.broadcast %c185_i32 : i32 to vector<24x185xi32>
    %49 = arith.select %47, %45, %48 : vector<24x185xi1>, vector<24x185xi32>
    %cst_20 = arith.constant dense<2147483647> : vector<24xi32>
    %50 = vector.multi_reduction <minsi>, %49, %cst_20 [1] : vector<24x185xi32> to vector<24xi32>
    %51 = vector.shape_cast %50 : vector<24xi32> to vector<24x1xi32>
    %52 = arith.sitofp %51 : vector<24x1xi32> to vector<24x1xf32>
    %cst_21 = arith.constant 1.600000e+01 : f32
    %53 = vector.broadcast %cst_21 : f32 to vector<24x1xf32>
    %54 = arith.addf %52, %53 : vector<24x1xf32>
    %cst_22 = arith.constant 1.000000e-10 : f32
    %55 = vector.broadcast %cst_22 : f32 to vector<24x1xf32>
    %56 = arith.addf %54, %55 : vector<24x1xf32>
    %cst_23 = arith.constant 1.600000e+04 : f32
    %57 = vector.broadcast %cst_23 : f32 to vector<24x1xf32>
    %58 = arith.divf %57, %56 : vector<24x1xf32>
    %cst_24 = arith.constant 3.000000e-01 : f32
    %59 = vector.broadcast %cst_24 : f32 to vector<24x1xf32>
    %60 = arith.cmpf olt, %44, %59 : vector<24x1xf32>
    %cst_25 = arith.constant 0.000000e+00 : f32
    %61 = vector.broadcast %cst_25 : f32 to vector<24x1xf32>
    %62 = arith.select %60, %61, %58 : vector<24x1xi1>, vector<24x1xf32>
    %63 = vector.broadcast %25 : f32 to vector<24x1xf32>
    %64 = arith.cmpf olt, %24, %63 : vector<24x1xf32>
    %cst_26 = arith.constant 0.000000e+00 : f32
    %65 = vector.broadcast %cst_26 : f32 to vector<24x1xf32>
    %66 = arith.select %64, %65, %62 : vector<24x1xi1>, vector<24x1xf32>
    %cst_27 = arith.constant 0.000000e+00 : f32
    %67 = vector.broadcast %cst_27 : f32 to vector<24x110xf32>
    %68 = tpu.concatenate %20, %66, %24, %67 in 1 : vector<24x16xf32>, vector<24x1xf32>, vector<24x1xf32>, vector<24x110xf32> -> vector<24x128xf32>
    %c0_28 = arith.constant 0 : index
    %c0_29 = arith.constant 0 : index
    %69 = vector.load %arg7[%c0_28, %c0_29] : memref<24x128xf32, #tpu.memory_space<vmem>>, vector<24x128xf32>
    tpu.vector_store %arg7[%c0_28, %c0_29], %68 {strides = array<i32>} : memref<24x128xf32, #tpu.memory_space<vmem>>, vector<24x128xf32>,
    return
  }
  func.func @transform_0(%arg0: i32) -> (i32, i32) {
    %c0_i32 = arith.constant 0 : i32
    %c0_i32_0 = arith.constant 0 : i32
    return %arg0, %c0_i32 : i32, i32
  }
  func.func @transform_1(%arg0: i32) -> (i32, i32) {
    %c3_i32 = arith.constant 3 : i32
    %0 = arith.muli %arg0, %c3_i32 : i32
    %c3_i32_0 = arith.constant 3 : i32
    %1 = arith.addi %0, %c3_i32_0 : i32
    %c0_i32 = arith.constant 0 : i32
    %c0_i32_1 = arith.constant 0 : i32
    return %1, %c0_i32 : i32, i32
  }
  func.func @transform_2(%arg0: i32) -> (i32, i32) {
    %c0_i32 = arith.constant 0 : i32
    %c0_i32_0 = arith.constant 0 : i32
    %c0_i32_1 = arith.constant 0 : i32
    return %c0_i32, %c0_i32_0 : i32, i32
  }
  func.func @transform_3(%arg0: i32) -> (i32, i32) {
    %c0_i32 = arith.constant 0 : i32
    %c0_i32_0 = arith.constant 0 : i32
    %c0_i32_1 = arith.constant 0 : i32
    return %c0_i32, %c0_i32_0 : i32, i32
  }
  func.func @transform_4(%arg0: i32) -> (i32, i32) {
    %c0_i32 = arith.constant 0 : i32
    %c0_i32_0 = arith.constant 0 : i32
    %c0_i32_1 = arith.constant 0 : i32
    return %c0_i32, %c0_i32_0 : i32, i32
  }
  func.func @transform_5(%arg0: i32) -> (i32, i32) {
    %c0_i32 = arith.constant 0 : i32
    %c0_i32_0 = arith.constant 0 : i32
    %c0_i32_1 = arith.constant 0 : i32
    return %c0_i32, %c0_i32_0 : i32, i32
  }
  func.func @transform_6(%arg0: i32) -> (i32, i32) {
    %c0_i32 = arith.constant 0 : i32
    %c0_i32_0 = arith.constant 0 : i32
    return %arg0, %c0_i32 : i32, i32
  }
}

</mosaic_0001>

<bundles_post_ra>
// kernel: feature_extractor_forward.1
= control target key start
LH: loop header
LB: loop body
LE: loop exit
PB: predicated region body
PF: predicated region fallthrough
CT: control target
= control target key end

     0   :  { %s1948_s0 = inlined_call_operand.vmem [shape: f32[56,32], index: 0, kind: input, shape index: {}, may-alias: {0,1}]   ;;  %s1949_s1 = inlined_call_operand.vmem [shape: f32[56,32], index: 1, kind: input, shape index: {}, may-alias: {0,1}]   ;;  %s1950_s2 = inlined_call_operand.hbm [shape: f32[128,384], index: 2, kind: input, shape index: {}]   ;;  %s1951_s3 = inlined_call_operand.vmem [shape: f32[128,16], index: 3, kind: input, shape index: {}]   ;;  %s1952_s4 = inlined_call_operand.hbm [shape: f32[256,185], index: 4, kind: input, shape index: {}]   ;;  %s1953_s5 = inlined_call_operand.<no memory space> [shape: f32[1,1], index: 5, kind: input, shape index: {}]   ;;  %s1954_s6 = inlined_call_operand.vmem [shape: f32[48,128], index: 6, kind: output, shape index: {}]  }
   0x1   :  { %11 = sst [smem:[#allocation2]] %s1953_s5 }
   0x2   :  { %12 = vsyncpa [#allocation4], 0 }
   0x3   :  { %13 = vsyncpa [#allocation6], 0  ;;  %s1626_s23 = smov 0  }
   0x4 LB: > { %s1576_s24 = smov [#allocation3]   ;;  %s1163_s26 = sadd.s32 4294967295, %s1574_s23   ;;  %s1574_s23 = sphi %s1626_s23, %s19_s23  }
   0x5   : > { %s202_s25 = sshll.u32 %s1576_s24, 4  ;;  %p1165_p0 = scmp.ge.s32.totalorder %s1574_s23, 1  ;;  %s203_s25 = int_to_ptr.vmem [resolvable:$true] %s202_s25 }
   0x6   : > { %p190_p1 = scmp.lt.s32.totalorder %s1574_s23, 3  ;;  %p1640_p3 = scmp.eq.s32.totalorder %s1163_s26, 0 }
   0x7   : > { %s1577_s28 = smov [#allocation5]   ;;  %s1504_s9 = scalar_lea.hbm %s1950_s2, 6144 }
   0x8   : > { %p1634_p2 = pnand %p1165_p0, %p190_p1  ;;  %s218_s29 = sshll.u32 %s1577_s28, 4  ;;  %s1652_s29 = int_to_ptr.vmem [resolvable:$true] %s218_s29 }
   0x9   : > { %s1959_s27 = scalar_select %p1640_p3, 1, 0 }
   0xa   : > { %s1958_s5 = scalar_select %p1634_p2, 1, 0 }
   0xb   : > { %p1449_p4 = pneg %p1634_p2  ;;  %p1505_p6 = scmp.ne.s32.totalorder %s1950_s2, %s1504_s9 }
   0xc   : > { %p1511_p10 = scmp.lt.u32.totalorder %s1504_s9, %s1950_s2 }
   0xd   : > { %p1648_p5 = pnand %p1640_p3, %p1449_p4 }
   0xf   : > { %p1506_p7 = pneg %p1648_p5 }
  0x11   : > { %p1507_p8 = pnand %p1506_p7, %p1505_p6 }
  0x13   : > { %p1508_p9 = pneg %p1507_p8 }
  0x15   : > { %p1513_p11 = pnand %p1511_p10, %p1508_p9 }
  0x17   : > { %1516 = shalt.err (!%p1513_p11)
}
  0x18   : > { %s1517_s14 = scalar_lea.vmem %s203_s25, 6144  ;;  %p1525_p1 = scmp.lt.s32.totalorder %s203_s25, %s203_s25 }
  0x19   : > { %p1518_p12 = scmp.ne.s32.totalorder %s203_s25, %s1517_s14  ;;  %p1526_p4 = scmp.lt.s32.totalorder %s1517_s14, %s1517_s14 }
  0x1b   : > { %p1520_p13 = pnand %p1518_p12, %p1506_p7  ;;  %p1527_p3 = por %p1526_p4, %p1525_p1 }
  0x1d   : > { %p1521_p0 = pneg %p1520_p13 }
  0x1f   : > { %p1528_p2 = pnand %p1527_p3, %p1521_p0 }
  0x21   : > { %1531 = shalt.err (!%p1528_p2)
}
  0x22   : > { %s1578_s15 = smov 384   ;;  %s1579_s16 = smov 24  }
  0x23   : > { %1452 = dma.hbm_to_vmem [thread:$0]  (!%p1648_p5), %s1950_s2, 6144, %s203_s25, [#allocation4], %s1578_s15, %s1578_s15, %s1579_s16  }
  0x24   : > { %s1532_s21 = scalar_lea.hbm %s1952_s4, 8192 }
  0x25   : > { %p1533_p6 = scmp.ne.s32.totalorder %s1952_s4, %s1532_s21  ;;  %p1539_p8 = scmp.lt.u32.totalorder %s1532_s21, %s1952_s4 }
  0x27   : > { %p1535_p2 = pnand %p1533_p6, %p1506_p7 }
  0x29   : > { %p1536_p3 = pneg %p1535_p2 }
  0x2b   : > { %p1541_p9 = pnand %p1539_p8, %p1536_p3 }
  0x2d   : > { %1544 = shalt.err (!%p1541_p9)
}
  0x2e   : > { %s1545_s25 = scalar_lea.vmem %s1652_s29, 8192  ;;  %p1553_p13 = scmp.lt.s32.totalorder %s1652_s29, %s1652_s29 }
  0x2f   : > { %p1546_p10 = scmp.ne.s32.totalorder %s1652_s29, %s1545_s25  ;;  %p1554_p0 = scmp.lt.s32.totalorder %s1545_s25, %s1545_s25 }
  0x31   : > { %p1548_p11 = pnand %p1546_p10, %p1506_p7  ;;  %p1555_p1 = por %p1554_p0, %p1553_p13 }
  0x33   : > { %p1549_p12 = pneg %p1548_p11 }
  0x35   : > { %p1556_p4 = pnand %p1555_p1, %p1549_p12 }
  0x37   : > { %1559 = shalt.err (!%p1556_p4)
}
  0x38   : > { %s1580_s8 = smov 256   ;;  %s1581_s9 = smov 16  }
  0x39   : > { %1455 = dma.hbm_to_vmem [thread:$0]  (!%p1648_p5), %s1952_s4, 8192, %s1652_s29, [#allocation6], %s1580_s8, %s1580_s8, %s1581_s9  }
  0x3a   : > { %p1961_p6 = scmp.ne.s32.totalorder %s1958_s5, 0 }
  0x3b   : > { %p1962_p7 = scmp.ne.s32.totalorder (!%p1961_p6), %s1959_s27, 0 }
  0x3c   : > { %265 = sbr.rel (%p1961_p6) target bundleno = 1114 (0x45a), region = 44 }
  0x43   : > { %1565 = dma.done.wait (%p1962_p7), [#allocation4], 6144  }
  0x44   : > { %1567 = vsyncadd (%p1962_p7), [#allocation4], 4294961152 }
  0x45   : > { %1569 = dma.done.wait (%p1962_p7), [#allocation6], 8192  }
  0x46   : > { %1571 = vsyncadd (%p1962_p7), [#allocation6], 4294959104  ;;  %s1713_s30 = smul.u32 3, %s1163_s26  ;;  %v345_v0 = vlaneseq  ;;  %v1582_v1 = vmov 0.0|0.0   ;;  %v1583_v3 = vmov 0.0   ;;  %vm1584_vm0 = vmmov 0  }
  0x47   : > { %1329 = vmatprep.subr.bf16.mxu1 %v1582_v1  ;;  %527 = vmatprep.mubr.f32.mxu0 %v1583_v3  ;;  %v416_v4 = vld [vmem:[#allocation3 + $0x8] sm:$0xff]  ;;  %v419_v5 = vld [vmem:[#allocation3 + $0x20] sm:$0xff]  ;;  %v418_v18 = vld [vmem:[#allocation3 + $0x18] sm:$0xff]  ;;  %s1585_s18 = smov 32   ;;  %s1586_s19 = smov 96   ;;  %vm403_vm4 = vcmask 261120  }
  0x48   : > { %p314_p5 = scmp.lt.s32.totalorder %s1713_s30, 6  ;;  %s324_s5 = sadd.s32 3, %s1713_s30  ;;  %v1720_v2 = vshrl.u32 %v345_v0, 7  ;;  %1247 = vmatprep.mubr.msk.f32.mxu1 %vm1584_vm0, %v1583_v3  ;;  %v1297_v9 = vpack.c.bf16 %v419_v5, %v416_v4  ;;  %v415_v17 = vld [vmem:[#allocation3] sm:$0xff]  ;;  %v417_v19 = vld [vmem:[#allocation3 + $0x10] sm:$0xff]  ;;  %v420_v22 = vld [vmem:[#allocation3 + $0x28] sm:$0xff] }
  0x49   : > { %p325_p2 = scmp.lt.s32.totalorder %s324_s5, 6  ;;  %v422_v23 = vld [vmem:[#allocation3 + $0x38] sm:$0xff]  ;;  %v425_v24 = vld [vmem:[#allocation3 + $0x50] sm:$0xff]  ;;  %v424_v27 = vld [vmem:[#allocation3 + $0x48] sm:$0xff]  ;;  %v1299_v32 = vpack.c.bf16 %v418_v18, %v415_v17  ;;  %v1330_v34 = vpack.c.bf16 %v420_v22, %v417_v19  ;;  %s1587_s20 = smov 64   ;;  %vm407_vm5 = vcmask 523264  }
  0x4a   : > { %s315_s29 = scalar_select %p314_p5, %s1713_s30, 6  ;;  %vm347_vm1 = vcmp.lt.s32.totalorder %v1720_v2, 7  ;;  %vm363_vm2 = vcmp.lt.s32.totalorder %v1720_v2, 5  ;;  %vm355_vm3 = vcmp.lt.s32.totalorder %v1720_v2, 6  ;;  %1298 = vmatprep.subr.bf16.mxu0 %v1297_v9  ;;  %v421_v26 = vld [vmem:[#allocation3 + $0x30] sm:$0xff]  ;;  %v423_v33 = vld [vmem:[#allocation3 + $0x40] sm:$0xff]  ;;  %v1301_v35 = vpack.c.bf16 %v425_v24, %v422_v23 }
  0x4b   : > { %s1964_s5 = smov (!%p325_p2, %s324_s5), 6  ;;  %v426_v36 = vld [vmem:[#allocation3 + $0x58] sm:$0xff]  ;;  %v428_v37 = vld [vmem:[#allocation3 + $0x68] sm:$0xff]  ;;  %v431_v38 = vld [vmem:[#allocation3 + $0x80] sm:$0xff]  ;;  %1300 = vmatpush1.bf16.msra.mxu0 %v1299_v32  ;;  %v1303_v39 = vpack.c.bf16 %v424_v27, %v421_v26  ;;  %1331 = vmatpush3.bf16.msra.mxu1 %v1330_v34  ;;  %vm411_vm6 = vcmask 785408   ;;  %vm951_vm7 = vcmask 465920  }
  0x4c   : > { %s1172_s26 = sshll.u32 %s315_s29, 3  ;;  %s1173_s14 = sshll.u32 %s1964_s5, 3  ;;  %v427_v42 = vld [vmem:[#allocation3 + $0x60] sm:$0xff]  ;;  %v430_v43 = vld [vmem:[#allocation3 + $0x78] sm:$0xff]  ;;  %1302 = vmatprep.subr.bf16.mxu0 %v1301_v35  ;;  %v1333_v46 = vpack.c.bf16 %v426_v36, %v423_v33  ;;  %v1305_v47 = vpack.c.bf16 %v431_v38, %v428_v37  ;;  %v429_v48 = vld [vmem:[#allocation3 + $0x70] sm:$0xff]  ;;  %1332 = vmatprep.subr.bf16.mxu1 %v1582_v1 }
  0x4d   : > { %s317_s13 = scalar_lea.vmem %s1948_s0, %s1172_s26  ;;  %s328_s17 = scalar_lea.vmem %s1949_s1, %s1173_s14  ;;  %v432_v49 = vld [vmem:[#allocation3 + $0x88] sm:$0xff]  ;;  %v434_v50 = vld [vmem:[#allocation3 + $0x98] sm:$0xff]  ;;  %v437_v51 = vld [vmem:[#allocation3 + $0xb0] sm:$0xff]  ;;  %v1307_v52 = vpack.c.bf16 %v430_v43, %v427_v42 }
  0x4e   : > { %v1728_v6 = vld [vmem:[%s317_s13] sm:$0xff]  ;;  %v1730_v7 = vld [vmem:[%s317_s13 + $0x8] sm:$0xff]  ;;  %v1735_v8 = vld [vmem:[%s317_s13 + $0x10] sm:$0xff]  ;;  %v1336_v58 = vpack.c.bf16 %v432_v49, %v429_v48  ;;  %v1309_v59 = vpack.c.bf16 %v437_v51, %v434_v50  ;;  %s764_s11 = sld [smem:[#allocation2]]  ;;  %p332_p3 = scmp.lt.s32.totalorder %s1713_s30, 5 }
  0x4f   : > { %v341_v10 = vrot.slane %v1728_v6, 1  ;;  %v342_v11 = vrot.slane %v1730_v7, 1  ;;  %v359_v12 = vrot.slane %v1728_v6, 3  ;;  %v360_v13 = vrot.slane %v1730_v7, 3  ;;  %v340_v31 = vld [vmem:[%s328_s17] sm:$0xff]  ;;  %1304 = vmatpush1.bf16.msra.mxu0 %v1303_v39  ;;  %v433_v54 = vld [vmem:[#allocation3 + $0x90] sm:$0xff]  ;;  %1334 = vmatpush3.bf16.msra.mxu1 %v1333_v46 }
  0x50   : > { %v351_v14 = vrot.slane %v1728_v6, 2  ;;  %v352_v15 = vrot.slane %v1730_v7, 2  ;;  %v343_v16 = vrot.slane %v1735_v8, 1  ;;  %v353_v25 = vrot.slane %v1735_v8, 2  ;;  %v436_v55 = vld [vmem:[#allocation3 + $0xa8] sm:$0xff]  ;;  %1306 = vmatprep.subr.bf16.mxu0 %v1305_v47  ;;  %v443_v61 = vld [vmem:[#allocation3 + $0xe0] sm:$0xff]  ;;  %1335 = vmatprep.subr.bf16.mxu1 %v1582_v1 }
  0x51   : > { %v350_v20 = vsel %vm347_vm1, %v341_v10, %v342_v11  ;;  %v366_v21 = vsel %vm363_vm2, %v359_v12, %v360_v13  ;;  %v361_v30 = vrot.slane %v1735_v8, 3  ;;  %v344_v41 = vrot.slane %v340_v31, 1  ;;  %v440_v60 = vld [vmem:[#allocation3 + $0xc8] sm:$0xff]  ;;  %v435_v62 = vld [vmem:[#allocation3 + $0xa0] sm:$0xff]  ;;  %v438_v63 = vld [vmem:[#allocation3 + $0xb8] sm:$0xff]  ;;  %s1966_s30 = smov (!%p332_p3, %s1713_s30), 5 }
  0x52   : > { %370 = vrot.lane.b32.xlu0 %v350_v20, %s1585_s18  ;;  %394 = vrot.lane.b32.xlu1 %v366_v21, %s1586_s19  ;;  %v358_v28 = vsel %vm355_vm3, %v351_v14, %v352_v15  ;;  %v349_v29 = vsel %vm347_vm1, %v342_v11, %v343_v16  ;;  %v357_v40 = vsel %vm355_vm3, %v352_v15, %v353_v25  ;;  %v354_v45 = vrot.slane %v340_v31, 2  ;;  %v439_v9 = vld [vmem:[#allocation3 + $0xc0] sm:$0xff]  ;;  %v442_v10 = vld [vmem:[#allocation3 + $0xd8] sm:$0xff]  ;;  %v449_v14 = vld [vmem:[#allocation3 + $0x110] sm:$0xff]  ;;  %s1174_s5 = sshll.u32 %s1966_s30, 3 }
  0x53   : > { %v365_v44 = vsel %vm363_vm2, %v360_v13, %v361_v30  ;;  %v348_v53 = vsel %vm347_vm1, %v343_v16, %v344_v41  ;;  %v362_v57 = vrot.slane %v340_v31, 3  ;;  %1308 = vmatpush1.bf16.msra.mxu0 %v1307_v52  ;;  %v1311_v4 = vpack.c.bf16 %v436_v55, %v433_v54  ;;  %1337 = vmatpush3.bf16.msra.mxu1 %v1336_v58  ;;  %v446_v13 = vld [vmem:[#allocation3 + $0xf8] sm:$0xff]  ;;  %v441_v15 = vld [vmem:[#allocation3 + $0xd0] sm:$0xff]  ;;  %v444_v16 = vld [vmem:[#allocation3 + $0xe8] sm:$0xff]  ;;  %s1925_s27 = scalar_lea.vmem %s1954_s6, %s1174_s5 }
  0x54   : > { %v356_v56 = vsel %vm355_vm3, %v353_v25, %v354_v45  ;;  %v1313_v5 = vpack.c.bf16 %v443_v61, %v440_v60  ;;  %1310 = vmatprep.subr.bf16.mxu0 %v1309_v59  ;;  %v1339_v12 = vpack.c.bf16 %v438_v63, %v435_v62  ;;  %1338 = vmatprep.subr.bf16.mxu1 %v1582_v1  ;;  %v445_v19 = vld [vmem:[#allocation3 + $0xf0] sm:$0xff]  ;;  %v448_v20 = vld [vmem:[#allocation3 + $0x108] sm:$0xff]  ;;  %v455_v22 = vld [vmem:[#allocation3 + $0x140] sm:$0xff] }
  0x55   : > { %v364_v11 = vsel %vm363_vm2, %v361_v30, %v362_v57  ;;  %v1315_v17 = vpack.c.bf16 %v442_v10, %v439_v9  ;;  %v1317_v18 = vpack.c.bf16 %v449_v14, %v446_v13  ;;  %v1342_v2 = vpack.c.bf16 %v444_v16, %v441_v15  ;;  %v452_v21 = vld [vmem:[#allocation3 + $0x128] sm:$0xff]  ;;  %v447_v23 = vld [vmem:[#allocation3 + $0x100] sm:$0xff]  ;;  %v450_v24 = vld [vmem:[#allocation3 + $0x118] sm:$0xff] }
  0x56   : > { %382 = vrot.lane.b32.xlu0 %v358_v28, %s1587_s20  ;;  %372 = vrot.lane.b32.xlu1 %v349_v29, %s1585_s18  ;;  %v1319_v25 = vpack.c.bf16 %v448_v20, %v445_v19  ;;  %v1321_v26 = vpack.c.bf16 %v455_v22, %v452_v21  ;;  %v451_v27 = vld [vmem:[#allocation3 + $0x120] sm:$0xff]  ;;  %v454_v28 = vld [vmem:[#allocation3 + $0x138] sm:$0xff]  ;;  %v1345_v29 = vpack.c.bf16 %v450_v24, %v447_v23  ;;  %v461_v31 = vld [vmem:[#allocation3 + $0x170] sm:$0xff] }
  0x57   : > { %1312 = vmatpush1.bf16.msra.mxu0 %v1311_v4  ;;  %1340 = vmatpush3.bf16.msra.mxu1 %v1339_v12  ;;  %v458_v30 = vld [vmem:[#allocation3 + $0x158] sm:$0xff]  ;;  %v453_v32 = vld [vmem:[#allocation3 + $0x130] sm:$0xff]  ;;  %v456_v33 = vld [vmem:[#allocation3 + $0x148] sm:$0xff]  ;;  %v1323_v34 = vpack.c.bf16 %v454_v28, %v451_v27 }
  0x58   : > { %1314 = vmatprep.subr.bf16.mxu0 %v1313_v5  ;;  %1341 = vmatprep.subr.bf16.mxu1 %v1582_v1  ;;  %v1325_v35 = vpack.c.bf16 %v461_v31, %v458_v30  ;;  %v457_v36 = vld [vmem:[#allocation3 + $0x150] sm:$0xff]  ;;  %v460_v37 = vld [vmem:[#allocation3 + $0x168] sm:$0xff]  ;;  %v1348_v38 = vpack.c.bf16 %v456_v33, %v453_v32  ;;  %v459_v39 = vld [vmem:[#allocation3 + $0x160] sm:$0xff] }
  0x59   : > { %v1327_v41 = vpack.c.bf16 %v460_v37, %v457_v36  ;;  %v795_v59 = vld [vmem:[#allocation5 + $0x18] sm:$0xff]  ;;  %v792_v60 = vld [vmem:[#allocation5] sm:$0xff]  ;;  %v794_v62 = vld [vmem:[#allocation5 + $0x10] sm:$0xff] }
  0x5a   : > { %384 = vrot.lane.b32.xlu0 %v357_v40, %s1587_s20  ;;  %396 = vrot.lane.b32.xlu1 %v365_v44, %s1586_s19  ;;  %v462_v40 = vld [vmem:[#allocation3 + $0x178] sm:$0xff]  ;;  %v1379_v63 = vpack.c.bf16 %v794_v62, %v792_v60  ;;  %v797_v4 = vld [vmem:[#allocation5 + $0x28] sm:$0xff]  ;;  %v796_v9 = vld [vmem:[#allocation5 + $0x20] sm:$0xff] }
  0x5b   : > { %1316 = vmatpush1.bf16.msra.mxu0 %v1315_v17  ;;  %1343 = vmatpush3.bf16.msra.mxu1 %v1342_v2  ;;  %v1351_v42 = vpack.c.bf16 %v462_v40, %v459_v39  ;;  %v799_v5 = vld [vmem:[#allocation5 + $0x38] sm:$0xff]  ;;  %v801_v12 = vld [vmem:[#allocation5 + $0x48] sm:$0xff]  ;;  %v800_v16 = vld [vmem:[#allocation5 + $0x40] sm:$0xff] }
  0x5c   : > { %1318 = vmatprep.subr.bf16.mxu0 %v1317_v18  ;;  %1344 = vmatprep.subr.bf16.mxu1 %v1582_v1  ;;  %v1381_v10 = vpack.c.bf16 %v799_v5, %v797_v4  ;;  %v803_v13 = vld [vmem:[#allocation5 + $0x58] sm:$0xff]  ;;  %v802_v17 = vld [vmem:[#allocation5 + $0x50] sm:$0xff]  ;;  %v805_v19 = vld [vmem:[#allocation5 + $0x68] sm:$0xff] }
  0x5d   : > { %v1385_v15 = vpack.c.bf16 %v803_v13, %v801_v12  ;;  %v1387_v18 = vpack.c.bf16 %v802_v17, %v800_v16  ;;  %v807_v20 = vld [vmem:[#allocation5 + $0x78] sm:$0xff]  ;;  %v804_v2 = vld [vmem:[#allocation5 + $0x60] sm:$0xff]  ;;  %v806_v22 = vld [vmem:[#allocation5 + $0x70] sm:$0xff] }
  0x5e   : > { %374 = vrot.lane.b32.xlu0 %v348_v53, %s1585_s18  ;;  %386 = vrot.lane.b32.xlu1 %v356_v56, %s1587_s20  ;;  %v1389_v21 = vpack.c.bf16 %v807_v20, %v805_v19  ;;  %v809_v23 = vld [vmem:[#allocation5 + $0x88] sm:$0xff]  ;;  %v811_v24 = vld [vmem:[#allocation5 + $0x98] sm:$0xff]  ;;  %v808_v27 = vld [vmem:[#allocation5 + $0x80] sm:$0xff] }
  0x5f   : > { %1320 = vmatpush1.bf16.msra.mxu0 %v1319_v25  ;;  %1346 = vmatpush3.bf16.msra.mxu1 %v1345_v29  ;;  %v1391_v25 = vpack.c.bf16 %v806_v22, %v804_v2  ;;  %v810_v28 = vld [vmem:[#allocation5 + $0x90] sm:$0xff]  ;;  %v813_v29 = vld [vmem:[#allocation5 + $0xa8] sm:$0xff]  ;;  %v815_v30 = vld [vmem:[#allocation5 + $0xb8] sm:$0xff] }
  0x60   : > { %1322 = vmatprep.subr.bf16.mxu0 %v1321_v26  ;;  %1347 = vmatprep.subr.bf16.mxu1 %v1582_v1  ;;  %v1393_v26 = vpack.c.bf16 %v811_v24, %v809_v23  ;;  %v1395_v31 = vpack.c.bf16 %v810_v28, %v808_v27  ;;  %v629_v32 = vld [vmem:[%s1951_s3] sm:$0xff]  ;;  %v1397_v33 = vpack.c.bf16 %v815_v30, %v813_v29  ;;  %v630_v36 = vld [vmem:[%s1951_s3 + $0x8] sm:$0xff]  ;;  %v631_v40 = vld [vmem:[%s1951_s3 + $0x10] sm:$0xff] }
  0x61   : > { %v817_v37 = vld [vmem:[#allocation5 + $0xc8] sm:$0xff]  ;;  %v1354_v39 = vpack.c.bf16 %v630_v36, %v629_v32  ;;  %v826_v4 = vld [vmem:[#allocation5 + $0x110] sm:$0xff]  ;;  %v637_v5 = vld [vmem:[%s1951_s3 + $0x40] sm:$0xff] }
  0x62   : > { %398 = vrot.lane.b32.xlu0 %v364_v11, %s1586_s19  ;;  %v798_v11 = vld [vmem:[#allocation5 + $0x30] sm:$0xff]  ;;  %v828_v13 = vld [vmem:[#allocation5 + $0x120] sm:$0xff]  ;;  %v833_v19 = vld [vmem:[#allocation5 + $0x148] sm:$0xff] }
  0x63   : > { %1324 = vmatpush1.bf16.msra.mxu0 %v1323_v34  ;;  %1349 = vmatpush3.bf16.msra.mxu1 %v1348_v38  ;;  %v1383_v14 = vpack.c.bf16 %v798_v11, %v796_v9  ;;  %v812_v34 = vld [vmem:[#allocation5 + $0xa0] sm:$0xff]  ;;  %v819_v38 = vld [vmem:[#allocation5 + $0xd8] sm:$0xff]  ;;  %v638_v9 = vld [vmem:[%s1951_s3 + $0x48] sm:$0xff] }
  0x64   : > { %1326 = vmatprep.subr.bf16.mxu0 %v1325_v35  ;;  %1350 = vmatprep.subr.bf16.mxu1 %v1582_v1  ;;  %v814_v35 = vld [vmem:[#allocation5 + $0xb0] sm:$0xff]  ;;  %v831_v11 = vld [vmem:[#allocation5 + $0x138] sm:$0xff]  ;;  %v837_v27 = vld [vmem:[#allocation5 + $0x168] sm:$0xff] }
  0x65   : > { %v830_v16 = vld [vmem:[#allocation5 + $0x130] sm:$0xff]  ;;  %v835_v20 = vld [vmem:[#allocation5 + $0x158] sm:$0xff]  ;;  %v836_v32 = vld [vmem:[#allocation5 + $0x160] sm:$0xff] }
  0x66   : > { %v639_v17 = vld [vmem:[%s1951_s3 + $0x50] sm:$0xff]  ;;  %v1415_v2 = vpack.c.bf16 %v830_v16, %v828_v13  ;;  %v1417_v23 = vpack.c.bf16 %v835_v20, %v833_v19  ;;  %v839_v28 = vld [vmem:[#allocation5 + $0x178] sm:$0xff] }
  0x67   : > { %1328 = vmatpush1.bf16.msra.mxu0 %v1327_v41  ;;  %1352 = vmatpush3.bf16.msra.mxu1 %v1351_v42  ;;  %v632_v41 = vld [vmem:[%s1951_s3 + $0x18] sm:$0xff]  ;;  %v1399_v42 = vpack.c.bf16 %v814_v35, %v812_v34  ;;  %v834_v24 = vld [vmem:[#allocation5 + $0x150] sm:$0xff]  ;;  %v841_v34 = vld [vmem:[#allocation5 + $0x188] sm:$0xff] }
  0x68   : > { %1353 = vmatprep.subr.bf16.mxu0 %v1582_v1  ;;  %v843_v35 = vld [vmem:[#allocation5 + $0x198] sm:$0xff] }
  0xc4   : > { %v371_v43 = vpop.permute.xlu0 %370  ;;  %v395_v44 = vpop.permute.xlu1 %394 }
  0xc5   : > { %v404_v45 = vsel %vm403_vm4, %v1728_v6, %v371_v43  ;;  %v816_v43 = vld [vmem:[#allocation5 + $0xc0] sm:$0xff] }
  0xc8   : > { %v383_v46 = vpop.permute.xlu0 %382  ;;  %v373_v47 = vpop.permute.xlu1 %372 }
  0xc9   : > { %v408_v48 = vsel %vm407_vm5, %v404_v45, %v383_v46  ;;  %v405_v50 = vsel %vm403_vm4, %v1730_v7, %v373_v47  ;;  %v1401_v45 = vpack.c.bf16 %v819_v38, %v817_v37  ;;  %v818_v46 = vld [vmem:[#allocation5 + $0xd0] sm:$0xff]  ;;  %v633_v47 = vld [vmem:[%s1951_s3 + $0x20] sm:$0xff]  ;;  %v1425_v37 = vpack.c.bf16 %v843_v35, %v841_v34 }
  0xca   : > { %v1788_v49 = vsel %vm411_vm6, %v408_v48, %v395_v44  ;;  %v1357_v44 = vpack.c.bf16 %v632_v41, %v631_v40  ;;  %v634_v48 = vld [vmem:[%s1951_s3 + $0x28] sm:$0xff]  ;;  %v840_v38 = vld [vmem:[#allocation5 + $0x180] sm:$0xff]  ;;  %v847_v41 = vld [vmem:[#allocation5 + $0x1b8] sm:$0xff] }
  0xcb   : > { %765 = vadd.xlane.f32.xlu1 %v1788_v49  ;;  %528 = vmatmul.mubr.f32.vlgmr.msra.gmra.mrb[0].mxu0 %v1788_v49  ;;  %v845_v40 = vld [vmem:[#allocation5 + $0x1a8] sm:$0xff] }
  0xcc   : > { %1248 = vmatmul.mubr.f32.vlgmr.msra.gmra.mrb[0].mxu1 %v1788_v49  ;;  %v385_v51 = vpop.permute.xlu0 %384  ;;  %v397_v52 = vpop.permute.xlu1 %396  ;;  %533 = vmatprep.mubr.f32.mxu0 %v1583_v3 }
  0xcd   : > { %v409_v6 = vsel %vm407_vm5, %v405_v50, %v385_v51  ;;  %1250 = vmatprep.mubr.msk.f32.mxu1 %vm1584_vm0, %v1583_v3  ;;  %1355 = vmatpush3.bf16.msra.mxu0 %v1354_v39  ;;  %v821_v50 = vld [vmem:[#allocation5 + $0xe8] sm:$0xff]  ;;  %v823_v51 = vld [vmem:[#allocation5 + $0xf8] sm:$0xff]  ;;  %v842_v39 = vld [vmem:[#allocation5 + $0x190] sm:$0xff] }
  0xce   : > { %v1800_v53 = vsel %vm411_vm6, %v409_v6, %v397_v52  ;;  %1356 = vmatprep.subr.bf16.mxu0 %v1582_v1  ;;  %v1403_v52 = vpack.c.bf16 %v818_v46, %v816_v43  ;;  %v820_v6 = vld [vmem:[#allocation5 + $0xe0] sm:$0xff]  ;;  %v1429_v43 = vpack.c.bf16 %v847_v41, %v845_v40  ;;  %v849_v46 = vld [vmem:[#allocation5 + $0x1c8] sm:$0xff] }
  0xcf   : > { %767 = vadd.xlane.f32.xlu0 %v1800_v53  ;;  %534 = vmatmul.mubr.f32.gmra.mrb[2].mxu0 %v1800_v53 }
  0xd0   : > { %1251 = vmatmul.mubr.f32.gmra.mrb[2].mxu1 %v1800_v53  ;;  %v375_v7 = vpop.permute.xlu0 %374  ;;  %539 = vmatprep.mubr.f32.mxu0 %v1583_v3  ;;  %v387_v55 = vpop.permute.xlu1 %386 }
  0xd1   : > { %v406_v54 = vsel %vm403_vm4, %v1735_v8, %v375_v7  ;;  %1253 = vmatprep.mubr.msk.f32.mxu1 %vm1584_vm0, %v1583_v3  ;;  %v793_v8 = vld [vmem:[#allocation5 + $0x8] sm:$0xff]  ;;  %1358 = vmatpush3.bf16.msra.mxu0 %v1357_v44  ;;  %v1360_v7 = vpack.c.bf16 %v634_v48, %v633_v47  ;;  %v844_v44 = vld [vmem:[#allocation5 + $0x1a0] sm:$0xff]  ;;  %v851_v47 = vld [vmem:[#allocation5 + $0x1d8] sm:$0xff] }
  0xd2   : > { %v410_v56 = vsel %vm407_vm5, %v406_v54, %v387_v55  ;;  %v1377_v61 = vpack.c.bf16 %v795_v59, %v793_v8  ;;  %v1405_v54 = vpack.c.bf16 %v823_v51, %v821_v50  ;;  %v822_v55 = vld [vmem:[#allocation5 + $0xf0] sm:$0xff]  ;;  %1359 = vmatprep.subr.bf16.mxu0 %v1582_v1  ;;  %v825_v8 = vld [vmem:[#allocation5 + $0x108] sm:$0xff]  ;;  %v827_v59 = vld [vmem:[#allocation5 + $0x118] sm:$0xff]  ;;  %v1433_v50 = vpack.c.bf16 %v851_v47, %v849_v46 }
  0xd3   : > { %v1407_v60 = vpack.c.bf16 %v822_v55, %v820_v6  ;;  %v848_v51 = vld [vmem:[#allocation5 + $0x1c0] sm:$0xff] }
  0xd4   : > { %v399_v57 = vpop.permute.xlu0 %398  ;;  %1378 = vmatprep.subr.bf16.mxu1 %v1377_v61  ;;  %v824_v61 = vld [vmem:[#allocation5 + $0x100] sm:$0xff] }
  0xd5   : > { %v1812_v58 = vsel %vm411_vm6, %v410_v56, %v399_v57  ;;  %1380 = vmatpush1.bf16.msra.mxu1 %v1379_v63  ;;  %v635_v56 = vld [vmem:[%s1951_s3 + $0x30] sm:$0xff]  ;;  %v636_v57 = vld [vmem:[%s1951_s3 + $0x38] sm:$0xff]  ;;  %1361 = vmatpush3.bf16.msra.mxu0 %v1360_v7  ;;  %v1409_v63 = vpack.c.bf16 %v827_v59, %v825_v8  ;;  %v1411_v12 = vpack.c.bf16 %v826_v4, %v824_v61 }
  0xd6   : > { %769 = vadd.xlane.f32.xlu0 %v1812_v58  ;;  %540 = vmatmul.mubr.f32.gmra.mrb[4].mxu0 %v1812_v58  ;;  %v1363_v62 = vpack.c.bf16 %v636_v57, %v635_v56  ;;  %v644_v7 = vld [vmem:[%s1951_s3 + $0x78] sm:$0xff]  ;;  %v852_v57 = vld [vmem:[#allocation5 + $0x1e0] sm:$0xff]  ;;  %v854_v8 = vld [vmem:[#allocation5 + $0x1f0] sm:$0xff] }
  0xd7   : > { %1254 = vmatmul.mubr.f32.gmra.mrb[4].mxu1 %v1812_v58  ;;  %1288 = vmatprep.mubr.msk.f32.mxu0 %vm1584_vm0, %v1583_v3  ;;  %v855_v56 = vld [vmem:[#allocation5 + $0x1f8] sm:$0xff] }
  0xd8   : > { %1382 = vmatprep.subr.bf16.mxu1 %v1381_v10  ;;  %1362 = vmatprep.subr.bf16.mxu0 %v1582_v1  ;;  %v829_v10 = vld [vmem:[#allocation5 + $0x128] sm:$0xff] }
  0xd9   : > { %1384 = vmatpush1.bf16.msra.mxu1 %v1383_v14  ;;  %1364 = vmatpush3.bf16.msra.mxu0 %v1363_v62  ;;  %v1366_v14 = vpack.c.bf16 %v638_v9, %v637_v5 }
  0xda   : > { %1386 = vmatprep.subr.bf16.mxu1 %v1385_v15  ;;  %v1413_v15 = vpack.c.bf16 %v831_v11, %v829_v10  ;;  %1365 = vmatprep.subr.bf16.mxu0 %v1582_v1 }
  0xdd   : > { %1388 = vmatpush1.bf16.msra.mxu1 %v1387_v18  ;;  %v640_v18 = vld [vmem:[%s1951_s3 + $0x58] sm:$0xff]  ;;  %1367 = vmatpush3.bf16.msra.mxu0 %v1366_v14 }
  0xde   : > { %1390 = vmatprep.subr.bf16.mxu1 %v1389_v21  ;;  %v832_v21 = vld [vmem:[#allocation5 + $0x140] sm:$0xff]  ;;  %v1369_v22 = vpack.c.bf16 %v640_v18, %v639_v17  ;;  %1368 = vmatprep.subr.bf16.mxu0 %v1582_v1 }
  0xdf   : > { %v1419_v29 = vpack.c.bf16 %v834_v24, %v832_v21 }
  0xe1   : > { %1392 = vmatpush1.bf16.msra.mxu1 %v1391_v25  ;;  %v641_v25 = vld [vmem:[%s1951_s3 + $0x60] sm:$0xff]  ;;  %1370 = vmatpush3.bf16.msra.mxu0 %v1369_v22 }
  0xe2   : > { %1394 = vmatprep.subr.bf16.mxu1 %v1393_v26  ;;  %v642_v26 = vld [vmem:[%s1951_s3 + $0x68] sm:$0xff]  ;;  %1371 = vmatprep.subr.bf16.mxu0 %v1582_v1 }
  0xe3   : > { %v1372_v30 = vpack.c.bf16 %v642_v26, %v641_v25 }
  0xe5   : > { %1396 = vmatpush1.bf16.msra.mxu1 %v1395_v31  ;;  %v1421_v31 = vpack.c.bf16 %v839_v28, %v837_v27  ;;  %1373 = vmatpush3.bf16.msra.mxu0 %v1372_v30 }
  0xe6   : > { %1398 = vmatprep.subr.bf16.mxu1 %v1397_v33  ;;  %v838_v33 = vld [vmem:[#allocation5 + $0x170] sm:$0xff]  ;;  %1374 = vmatprep.subr.bf16.mxu0 %v1582_v1 }
  0xe7   : > { %v1423_v36 = vpack.c.bf16 %v838_v33, %v836_v32  ;;  %v643_v1 = vld [vmem:[%s1951_s3 + $0x70] sm:$0xff] }
  0xe8   : > { %v1375_v55 = vpack.c.bf16 %v644_v7, %v643_v1 }
  0xe9   : > { %1400 = vmatpush1.bf16.msra.mxu1 %v1399_v42  ;;  %v1427_v42 = vpack.c.bf16 %v842_v39, %v840_v38 }
  0xea   : > { %1402 = vmatprep.subr.bf16.mxu1 %v1401_v45  ;;  %v846_v45 = vld [vmem:[#allocation5 + $0x1b0] sm:$0xff]  ;;  %1376 = vmatpush3.bf16.msra.mxu0 %v1375_v55 }
  0xeb   : > { %v1431_v48 = vpack.c.bf16 %v846_v45, %v844_v44 }
  0xed   : > { %1404 = vmatpush1.bf16.msra.mxu1 %v1403_v52  ;;  %v850_v52 = vld [vmem:[#allocation5 + $0x1d0] sm:$0xff] }
  0xee   : > { %1406 = vmatprep.subr.bf16.mxu1 %v1405_v54  ;;  %v1435_v6 = vpack.c.bf16 %v850_v52, %v848_v51  ;;  %v853_v54 = vld [vmem:[#allocation5 + $0x1e8] sm:$0xff] }
  0xef   : > { %v1437_v59 = vpack.c.bf16 %v855_v56, %v853_v54 }
  0xf1   : > { %1408 = vmatpush1.bf16.msra.mxu1 %v1407_v60  ;;  %v1439_v60 = vpack.c.bf16 %v854_v8, %v852_v57 }
  0xf2   : > { %1410 = vmatprep.subr.bf16.mxu1 %v1409_v63 }
  0xf5   : > { %1412 = vmatpush1.bf16.msra.mxu1 %v1411_v12 }
  0xf6   : > { %1414 = vmatprep.subr.bf16.mxu1 %v1413_v15 }
  0xf9   : > { %1416 = vmatpush1.bf16.msra.mxu1 %v1415_v2 }
  0xfa   : > { %1418 = vmatprep.subr.bf16.mxu1 %v1417_v23 }
  0xfd   : > { %1420 = vmatpush1.bf16.msra.mxu1 %v1419_v29 }
  0xfe   : > { %1422 = vmatprep.subr.bf16.mxu1 %v1421_v31 }
 0x101   : > { %1424 = vmatpush1.bf16.msra.mxu1 %v1423_v36 }
 0x102   : > { %1426 = vmatprep.subr.bf16.mxu1 %v1425_v37 }
 0x105   : > { %1428 = vmatpush1.bf16.msra.mxu1 %v1427_v42 }
 0x106   : > { %1430 = vmatprep.subr.bf16.mxu1 %v1429_v43 }
 0x109   : > { %1432 = vmatpush1.bf16.msra.mxu1 %v1431_v48 }
 0x10a   : > { %1434 = vmatprep.subr.bf16.mxu1 %v1433_v50 }
 0x10d   : > { %1436 = vmatpush1.bf16.msra.mxu1 %v1435_v6 }
 0x10e   : > { %1438 = vmatprep.subr.bf16.mxu1 %v1437_v59 }
 0x111   : > { %1440 = vmatpush1.bf16.msra.mxu1 %v1439_v60 }
 0x158   : > { %v766_v61 = vpop.xlane.xlu1 %765 }
 0x159   : > { %v771_v62 = vmul.f32 0.0078125, %v766_v61 }
 0x15b   : > { %v774_v63 = vsub.f32 %v1788_v49, %v771_v62 }
 0x15c   : > { %v768_v4 = vpop.xlane.xlu0 %767 }
 0x15d   : > { %v772_v5 = vmul.f32 0.0078125, %v768_v4  ;;  %v777_v9 = vmul.f32 %v774_v63, %v774_v63 }
 0x15f   : > { %780 = vadd.xlane.f32.xlu1 %v777_v9  ;;  %v775_v10 = vsub.f32 %v1800_v53, %v772_v5 }
 0x161   : > { %v778_v11 = vmul.f32 %v775_v10, %v775_v10  ;;  %v965_v10 = vand.u32 127, %v345_v0 }
 0x163   : > { %782 = vadd.xlane.f32.xlu0 %v778_v11  ;;  %v770_v12 = vpop.xlane.xlu0 %769  ;;  %v966_v11 = vadd.s32 128, %v965_v10 }
 0x164   : > { %v773_v13 = vmul.f32 0.0078125, %v770_v12 }
 0x166   : > { %v776_v14 = vsub.f32 %v1812_v58, %v773_v13 }
 0x168   : > { %v779_v15 = vmul.f32 %v776_v14, %v776_v14 }
 0x16a   : > { %784 = vadd.xlane.f32.xlu1 %v779_v15 }
 0x19e   : > { %v529_v16 = vpop.f32.mrb[0].mxu0 }
 0x19f   : > { %v626_v17 = vmul.f32 %v529_v16, %v529_v16  ;;  %v612_v18 = vpop.f32.mrb[0].mxu1  ;;  %v531_v19 = vpop.f32.mrb[1].mxu0 }
 0x1a0   : > { %v787_v20 = vmul.f32 %v612_v18, %v612_v18  ;;  %v786_v2 = vmul.f32 %v531_v19, %v531_v19  ;;  %v1249_v21 = vpop.f32.mrb[1].mxu1 }
 0x1a1   : > { %1289 = vmatmul.mubr.f32.vlgmr.msra.gmra.mrb[6].mxu0 %v626_v17 }
 0x1a2   : > { %920 = vmatprep.mubr.f32.mxu1 %v787_v20  ;;  %v535_v22 = vpop.f32.mrb[2].mxu0  ;;  %1291 = vmatprep.mubr.msk.f32.mxu0 %vm1584_vm0, %v1583_v3 }
 0x1a3   : > { %v627_v23 = vmul.f32 %v535_v22, %v535_v22  ;;  %v617_v24 = vpop.f32.mrb[2].mxu1  ;;  %921 = vmatmul.mubr.f32.vlgmr.msra.gmra.mrb[6].mxu1 %v786_v2  ;;  %v537_v25 = vpop.f32.mrb[3].mxu0 }
 0x1a4   : > { %v789_v26 = vmul.f32 %v617_v24, %v617_v24  ;;  %v788_v27 = vmul.f32 %v537_v25, %v537_v25  ;;  %v1252_v28 = vpop.f32.mrb[3].mxu1 }
 0x1a5   : > { %1292 = vmatmul.mubr.f32.gmra.mrb[8].mxu0 %v627_v23 }
 0x1a6   : > { %926 = vmatprep.mubr.f32.mxu1 %v789_v26  ;;  %1294 = vmatprep.mubr.msk.f32.mxu0 %vm1584_vm0, %v1583_v3 }
 0x1a7   : > { %927 = vmatmul.mubr.f32.gmra.mrb[8].mxu1 %v788_v27 }
 0x1a9   : > { %v541_v29 = vpop.f32.mrb[4].mxu0 }
 0x1aa   : > { %v628_v30 = vmul.f32 %v541_v29, %v541_v29  ;;  %v622_v31 = vpop.f32.mrb[4].mxu1  ;;  %v543_v32 = vpop.f32.mrb[5].mxu0 }
 0x1ab   : > { %v791_v33 = vmul.f32 %v622_v31, %v622_v31  ;;  %v790_v34 = vmul.f32 %v543_v32, %v543_v32  ;;  %v1255_v35 = vpop.f32.mrb[5].mxu1 }
 0x1ac   : > { %1295 = vmatmul.mubr.f32.gmra.mrb[10].mxu0 %v628_v30 }
 0x1ad   : > { %932 = vmatprep.mubr.f32.mxu1 %v791_v33 }
 0x1ae   : > { %933 = vmatmul.mubr.f32.gmra.mrb[10].mxu1 %v790_v34 }
 0x1ec   : > { %v781_v36 = vpop.xlane.xlu1 %780 }
 0x1ed   : > { %v939_v37 = vadd.f32 1e-10, %v781_v36 }
 0x1ef   : > { %1480 = vrcp.f32 %v939_v37 }
 0x1f0   : > { %v783_v38 = vpop.xlane.xlu0 %782 }
 0x1f1   : > { %v940_v39 = vadd.f32 1e-10, %v783_v38 }
 0x1f3   : > { %1482 = vrcp.f32 %v940_v39 }
 0x1f7   : > { %v785_v40 = vpop.xlane.xlu1 %784 }
 0x1f8   : > { %v941_v41 = vadd.f32 1e-10, %v785_v40  ;;  %v734_v40 = vmul.f32 %v1788_v49, %v1788_v49 }
 0x1f9   : > { %v1481_v44 = vpop.eup %1480 }
 0x1fa   : > { %1484 = vrcp.f32 %v941_v41 }
 0x1fd   : > { %v1483_v6 = vpop.eup %1482 }
 0x204   : > { %v1485_v61 = vpop.eup %1484 }
 0x274   : > { %v1881_v3 = vpop.f32.mrb[6].mxu0 }
 0x275   : > { %v1290_v42 = vpop.f32.mrb[7].mxu0 }
 0x276   : > { %v922_v43 = vpop.f32.mrb[6].mxu1 }
 0x277   : > { %v924_v45 = vpop.f32.mrb[7].mxu1  ;;  %v945_v48 = vmul.f32 %v1481_v44, %v922_v43 }
 0x278   : > { %v946_v46 = vmul.f32 %v1481_v44, %v924_v45  ;;  %v1883_v47 = vpop.f32.mrb[8].mxu0  ;;  %v736_v44 = vmul.f32 %v1812_v58, %v1812_v58  ;;  %v735_v45 = vmul.f32 %v1800_v53, %v1800_v53 }
 0x279   : > { %v1293_v50 = vpop.f32.mrb[9].mxu0 }
 0x27a   : > { %v928_v51 = vpop.f32.mrb[8].mxu1  ;;  %v952_v52 = vsel %vm951_vm7, %v946_v46, -inf }
 0x27b   : > { %v930_v1 = vpop.f32.mrb[9].mxu1  ;;  %v953_v7 = vmax.f32 %v945_v48, %v952_v52  ;;  %v947_v55 = vmul.f32 %v1483_v6, %v928_v51 }
 0x27c   : > { %v948_v54 = vmul.f32 %v1483_v6, %v930_v1 }
 0x27d   : > { %954 = vmax.xlane.f32.xlu0 %v953_v7 }
 0x27e   : > { %v956_v56 = vsel %vm951_vm7, %v948_v54, -inf }
 0x27f   : > { %v1887_v57 = vpop.f32.mrb[10].mxu0  ;;  %v957_v8 = vmax.f32 %v947_v55, %v956_v56 }
 0x280   : > { %v1296_v59 = vpop.f32.mrb[11].mxu0 }
 0x281   : > { %v934_v60 = vpop.f32.mrb[10].mxu1  ;;  %958 = vmax.xlane.f32.xlu1 %v957_v8 }
 0x282   : > { %v936_v62 = vpop.f32.mrb[11].mxu1  ;;  %v949_v4 = vmul.f32 %v1485_v61, %v934_v60 }
 0x283   : > { %v950_v63 = vmul.f32 %v1485_v61, %v936_v62 }
 0x285   : > { %v960_v5 = vsel %vm951_vm7, %v950_v63, -inf }
 0x286   : > { %v961_v9 = vmax.f32 %v949_v4, %v960_v5 }
 0x288   : > { %962 = vmax.xlane.f32.xlu0 %v961_v9 }
 0x30a   : > { %v1891_v12 = vpop.xlane.xlu0 %954 }
 0x30b   : > { %vm967_vm8 = vcmp.ge.f32.partialorder %v945_v48, %v1891_v12  ;;  %vm968_vm9 = vcmp.ge.f32.partialorder %v946_v46, %v1891_v12  ;;  %vm1045_vm6 = vcmp.lt.f32.partialorder %v1891_v12, 0.3 }
 0x30c   : > { %v973_v13 = vsel %vm967_vm8, %v965_v10, 185  ;;  %v974_v14 = vsel %vm968_vm9, %v966_v11, 185  ;;  %vm1062_vm9 = vcmask 138240  }
 0x30d   : > { %v979_v15 = vsel %vm951_vm7, %v974_v14, 2147483647  ;;  %v727_v14 = vmax.f32 %v1887_v57, 1e-10 }
 0x30e   : > { %v1896_v16 = vpop.xlane.xlu1 %958  ;;  %vm980_vm10 = vcmp.lt.s32.totalorder %v973_v13, %v979_v15 }
 0x30f   : > { %vm969_vm11 = vcmp.ge.f32.partialorder %v947_v55, %v1896_v16  ;;  %vm970_vm12 = vcmp.ge.f32.partialorder %v948_v54, %v1896_v16  ;;  %v981_v17 = vsel %vm980_vm10, %v973_v13, %v979_v15  ;;  %v725_v55 = vmax.f32 %v1881_v3, 1e-10 }
 0x310   : > { %v975_v0 = vsel %vm969_vm11, %v965_v10, 185  ;;  %v976_v18 = vsel %vm970_vm12, %v966_v11, 185  ;;  %v983_v19 = vshra.s32 %v981_v17, 16  ;;  %v982_v31 = vand.u32 65535, %v981_v17 }
 0x311   : > { %v996_v20 = vsel %vm951_vm7, %v976_v18, 2147483647  ;;  %v726_v3 = vmax.f32 %v1883_v47, 1e-10  ;;  %v1051_v47 = vstv %s764_s11  ;;  %vm1066_vm10 = vcmask 146432  }
 0x312   : > { %v985_v2 = vcvt.s32.f32 %v983_v19  ;;  %vm997_vm13 = vcmp.lt.s32.totalorder %v975_v0, %v996_v20  ;;  %v984_v33 = vcvt.s32.f32 %v982_v31 }
 0x313   : > { %v998_v21 = vsel %vm997_vm13, %v975_v0, %v996_v20 }
 0x314   : > { %986 = vmin.xlane.f32.xlu1 %v985_v2  ;;  %v1000_v22 = vshra.s32 %v998_v21, 16  ;;  %v999_v34 = vand.u32 65535, %v998_v21 }
 0x315   : > { %v1901_v23 = vpop.xlane.xlu0 %962 }
 0x316   : > { %vm971_vm14 = vcmp.ge.f32.partialorder %v949_v4, %v1901_v23  ;;  %vm972_vm15 = vcmp.ge.f32.partialorder %v950_v63, %v1901_v23  ;;  %v1002_v24 = vcvt.s32.f32 %v1000_v22  ;;  %v1001_v37 = vcvt.s32.f32 %v999_v34 }
 0x317   : > { %v977_v25 = vsel %vm971_vm14, %v965_v10, 185  ;;  %v978_v26 = vsel %vm972_vm15, %v966_v11, 185  ;;  %vm1046_vm14 = vcmp.lt.f32.partialorder %v1896_v16, 0.3 }
 0x318   : > { %1003 = vmin.xlane.f32.xlu0 %v1002_v24  ;;  %v1013_v27 = vsel %vm951_vm7, %v978_v26, 2147483647  ;;  %vm1058_vm7 = vcmask 130048  }
 0x319   : > { %vm1014_vm0 = vcmp.lt.s32.totalorder %v977_v25, %v1013_v27 }
 0x31a   : > { %v1015_v28 = vsel %vm1014_vm0, %v977_v25, %v1013_v27 }
 0x31b   : > { %v1017_v29 = vshra.s32 %v1015_v28, 16  ;;  %v1016_v39 = vand.u32 65535, %v1015_v28 }
 0x31d   : > { %v1019_v30 = vcvt.s32.f32 %v1017_v29  ;;  %v1018_v42 = vcvt.s32.f32 %v1016_v39 }
 0x31f   : > { %1020 = vmin.xlane.f32.xlu1 %v1019_v30 }
 0x3a1   : > { %v987_v32 = vpop.xlane.xlu1 %986 }
 0x3a2   : > { %vm988_vm1 = vcmp.eq.f32.partialorder %v985_v2, %v987_v32  ;;  %v993_v46 = vcvt.f32.s32 %v987_v32 }
 0x3a3   : > { %v989_v35 = vsel %vm988_vm1, %v984_v33, inf  ;;  %vm1047_vm1 = vcmp.lt.f32.partialorder %v1901_v23, 0.3 }
 0x3a4   : > { %990 = vmin.xlane.f32.xlu0 %v989_v35  ;;  %v994_v50 = vshll.u32 %v993_v46, 16 }
 0x3a5   : > { %v1004_v36 = vpop.xlane.xlu0 %1003 }
 0x3a6   : > { %vm1005_vm2 = vcmp.eq.f32.partialorder %v1002_v24, %v1004_v36  ;;  %v1010_v51 = vcvt.f32.s32 %v1004_v36 }
 0x3a7   : > { %v1006_v38 = vsel %vm1005_vm2, %v1001_v37, inf }
 0x3a8   : > { %1007 = vmin.xlane.f32.xlu1 %v1006_v38  ;;  %v1011_v1 = vshll.u32 %v1010_v51, 16 }
 0x3ac   : > { %v1021_v41 = vpop.xlane.xlu1 %1020  ;;  %737 = vadd.xlane.f32.xlu1 %v734_v40 }
 0x3ad   : > { %vm1022_vm3 = vcmp.eq.f32.partialorder %v1019_v30, %v1021_v41  ;;  %v1027_v8 = vcvt.f32.s32 %v1021_v41 }
 0x3ae   : > { %v1023_v43 = vsel %vm1022_vm3, %v1018_v42, inf }
 0x3af   : > { %1024 = vmin.xlane.f32.xlu0 %v1023_v43  ;;  %v1028_v63 = vshll.u32 %v1027_v8, 16 }
 0x3b0   : > { %741 = vadd.xlane.f32.xlu1 %v736_v44 }
 0x3b3   : > { %739 = vadd.xlane.f32.xlu0 %v735_v45 }
 0x431   : > { %v991_v48 = vpop.xlane.xlu0 %990 }
 0x432   : > { %v992_v52 = vcvt.f32.s32 %v991_v48 }
 0x434   : > { %v995_v49 = vadd.s32 %v994_v50, %v992_v52 }
 0x435   : > { %v1008_v6 = vpop.xlane.xlu1 %1007 }
 0x436   : > { %v1030_v7 = vcvt.s32.f32 %v995_v49  ;;  %v1009_v54 = vcvt.f32.s32 %v1008_v6 }
 0x438   : > { %v1033_v56 = vadd.f32 16.0, %v1030_v7  ;;  %v1012_v58 = vadd.s32 %v1011_v1, %v1009_v54 }
 0x439   : > { %v738_v59 = vpop.xlane.xlu1 %737 }
 0x43a   : > { %v1036_v60 = vadd.f32 1e-10, %v1033_v56  ;;  %v1031_v53 = vcvt.s32.f32 %v1012_v58  ;;  %1486 = vrsqrt.f32 %v738_v59  ;;  %vm745_vm4 = vcmp.eq.f32.partialorder %v738_v59, inf }
 0x43b   : > { %1488 = vlog2.f32 %v725_v55  ;;  %v748_v2 = vand.u32 2147483648, %v738_v59  ;;  %vm747_vm5 = vcmp.eq.f32.partialorder %v738_v59, 0.0 }
 0x43c   : > { %1490 = vrcp.f32 %v1036_v60  ;;  %v1034_v61 = vadd.f32 16.0, %v1031_v53  ;;  %v1025_v62 = vpop.xlane.xlu0 %1024 }
 0x43d   : > { %v1026_v4 = vcvt.f32.s32 %v1025_v62  ;;  %v1913_v5 = vpop.xlane.xlu1 %741 }
 0x43e   : > { %v1037_v9 = vadd.f32 1e-10, %v1034_v61  ;;  %1492 = vrsqrt.f32 %v1913_v5  ;;  %vm759_vm11 = vcmp.eq.f32.partialorder %v1913_v5, inf  ;;  %v762_v39 = vand.u32 2147483648, %v1913_v5 }
 0x43f   : > { %v1029_v10 = vadd.s32 %v1028_v63, %v1026_v4  ;;  %vm761_vm15 = vcmp.eq.f32.partialorder %v1913_v5, 0.0 }
 0x440   : > { %1494 = vrcp.f32 %v1037_v9  ;;  %v740_v11 = vpop.xlane.xlu0 %739 }
 0x441   : > { %v1032_v13 = vcvt.s32.f32 %v1029_v10  ;;  %1496 = vrsqrt.f32 %v740_v11  ;;  %vm752_vm12 = vcmp.eq.f32.partialorder %v740_v11, inf  ;;  %v755_v36 = vand.u32 2147483648, %v740_v11 }
 0x442   : > { %1498 = vlog2.f32 %v726_v3  ;;  %vm754_vm13 = vcmp.eq.f32.partialorder %v740_v11, 0.0 }
 0x443   : > { %v1035_v15 = vadd.f32 16.0, %v1032_v13  ;;  %1500 = vlog2.f32 %v727_v14 }
 0x444   : > { %v1487_v17 = vpop.eup %1486 }
 0x445   : > { %v1489_v0 = vpop.eup %1488  ;;  %v744_v18 = vmul.f32 %v1487_v17, %v738_v59  ;;  %v1038_v19 = vadd.f32 1e-10, %v1035_v15 }
 0x446   : > { %v1491_v20 = vpop.eup %1490  ;;  %v729_v25 = vmul.f32 0.6931472, %v1489_v0 }
 0x447   : > { %v1040_v21 = vmul.f32 16000.0, %v1491_v20  ;;  %v746_v22 = vsel %vm745_vm4, %v738_v59, %v744_v18  ;;  %1502 = vrcp.f32 %v1038_v19 }
 0x448   : > { %v1493_v24 = vpop.eup %1492  ;;  %v749_v57 = vsel %vm747_vm5, %v748_v2, %v746_v22 }
 0x449   : > { %v1048_v26 = vsel %vm1045_vm6, 0.0, %v1040_v21  ;;  %vm1052_vm8 = vcmp.lt.f32.partialorder %v749_v57, %v1051_v47  ;;  %v758_v28 = vmul.f32 %v1493_v24, %v1913_v5 }
 0x44a   : > { %v1495_v27 = vpop.eup %1494  ;;  %v1055_v29 = vsel %vm1052_vm8, 0.0, %v1048_v26 }
 0x44b   : > { %v1497_v30 = vpop.eup %1496  ;;  %v1059_v12 = vsel %vm1058_vm7, %v729_v25, %v1055_v29  ;;  %v1042_v31 = vmul.f32 16000.0, %v1495_v27  ;;  %v760_v37 = vsel %vm759_vm11, %v1913_v5, %v758_v28 }
 0x44c   : > { %v1063_v32 = vsel %vm1062_vm9, %v1059_v12, %v749_v57  ;;  %v751_v33 = vmul.f32 %v1497_v30, %v740_v11  ;;  %v1499_v34 = vpop.eup %1498  ;;  %v763_v45 = vsel %vm761_vm15, %v762_v39, %v760_v37 }
 0x44d   : > { %v1067_v35 = vsel %vm1066_vm10, %v1063_v32, 0.0  ;;  %v1501_v41 = vpop.eup %1500  ;;  %v731_v42 = vmul.f32 0.6931472, %v1499_v34  ;;  %v1049_v43 = vsel %vm1046_vm14, 0.0, %v1042_v31  ;;  %vm1054_vm2 = vcmp.lt.f32.partialorder %v763_v45, %v1051_v47 }
 0x44e   : > { %1070 = vst [vmem:[%s1925_s27] sm:$0xff] %v1067_v35  ;;  %v753_v38 = vsel %vm752_vm12, %v740_v11, %v751_v33  ;;  %v733_v51 = vmul.f32 0.6931472, %v1501_v41 }
 0x44f   : > { %v756_v40 = vsel %vm754_vm13, %v755_v36, %v753_v38 }
 0x450   : > { %vm1053_vm0 = vcmp.lt.f32.partialorder %v756_v40, %v1051_v47 }
 0x451   : > { %v1503_v44 = vpop.eup %1502  ;;  %v1056_v46 = vsel %vm1053_vm0, 0.0, %v1049_v43 }
 0x452   : > { %v1044_v48 = vmul.f32 16000.0, %v1503_v44  ;;  %v1060_v50 = vsel %vm1058_vm7, %v731_v42, %v1056_v46 }
 0x453   : > { %v1064_v16 = vsel %vm1062_vm9, %v1060_v50, %v756_v40 }
 0x454   : > { %v1050_v52 = vsel %vm1047_vm1, 0.0, %v1044_v48  ;;  %v1068_v49 = vsel %vm1066_vm10, %v1064_v16, 0.0 }
 0x455   : > { %v1057_v6 = vsel %vm1054_vm2, 0.0, %v1050_v52  ;;  %1071 = vst [vmem:[%s1925_s27 + $0x8] sm:$0xff] %v1068_v49 }
 0x456   : > { %v1061_v1 = vsel %vm1058_vm7, %v733_v51, %v1057_v6 }
 0x457   : > { %v1065_v7 = vsel %vm1062_vm9, %v1061_v1, %v763_v45 }
 0x458   : > { %v1069_v54 = vsel %vm1066_vm10, %v1065_v7, 0.0 }
 0x459   : > { %1072 = vst [vmem:[%s1925_s27 + $0x10] sm:$0xff] %v1069_v54 }
 0x45a PF: > { %s19_s23 = sadd.s32 1, %s1574_s23  }
 0x45b   : > { %p16_p8 = scmp.ge.s32.totalorder %s19_s23, 4  }
 0x45d   :  { %18 = sbr.rel (!%p16_p8) target bundleno = 4 (0x4), region = 86 }
 0x464   :  { %1095 = vsyncpa [#allocation4], 1 }
 0x465   :  { %1097 = vsyncpa [#allocation4 + $0x1], 1 }
 0x466   :  { %1098 = vsyncpa [#allocation6], 1 }

</bundles_post_ra>
